<compile_context>
chip_gen: v7x
topology: tpu7x:2x2x1
jax: 0.10.0
libtpu: 0.0.40
codegen_flags: <defaults>
</compile_context>

<pallas_src>
import functools

import jax
import jax.numpy as jnp
from jax.experimental import pallas as pl
from jax.experimental.pallas import tpu as pltpu


def _round_up(x, m):
    return ((x + m - 1) // m) * m


def _patch_embed_kernel(x_ref, w_ref, b_ref, o_ref):
    # x_ref: (tm, K)  w_ref: (K, Ep)  b_ref: (1, Ep) f32  o_ref: (tm, Ep)
    acc = jnp.dot(x_ref[...], w_ref[...], preferred_element_type=jnp.float32)
    o_ref[...] = (acc + b_ref[...]).astype(o_ref.dtype)


@functools.partial(
    jax.jit, static_argnames=("patch_size", "tm_target", "compute_dtype"))
def patch_embed_forward(x, weight, bias, patch_size, tm_target=512,
                        compute_dtype=None):
    """x: (B, C, H, W) NCHW.  weight: (E, C, p, p) (PyTorch Conv2d layout).
    bias: (E,).  Returns (B, num_patches, E) in x.dtype."""
    B, C, H, W = x.shape
    E = weight.shape[0]
    p = patch_size
    assert H % p == 0 and W % p == 0, "img_size must be divisible by patch_size"
    gh, gw = H // p, W // p
    N = gh * gw
    K = C * p * p
    M = B * N

    out_dtype = x.dtype
    if compute_dtype is None:
        compute_dtype = x.dtype

    # Non-overlapping patch extraction (layout glue, fused under jit).
    # TODO(synk): accept NHWC input upstream to avoid the 6-D transpose
    # HBM round-trip entirely.
    patches = x.reshape(B, C, gh, p, gw, p)
    patches = patches.transpose(0, 2, 4, 1, 3, 5).reshape(M, K)
    w_mat = weight.reshape(E, K).T                         # (K, E)

    # E padded to a lane-dense multiple of 128 (unmasked output stores);
    # K left unpadded (block uses the full-K dim -> no extra HBM traffic);
    # M padded to a multiple of the row tile so no tile reads/writes OOB.
    E_pad = _round_up(E, 128)
    if M <= tm_target:
        tm = _round_up(M, 8)
        M_pad = tm
    else:
        tm = tm_target
        M_pad = _round_up(M, tm)

    patches = jnp.pad(patches, ((0, M_pad - M), (0, 0))).astype(compute_dtype)
    w_mat = jnp.pad(w_mat, ((0, 0), (0, E_pad - E))).astype(compute_dtype)
    b_mat = jnp.pad(bias, (0, E_pad - E)).reshape(1, E_pad).astype(jnp.float32)

    grid = (M_pad // tm,)
    itemsize_in = jnp.dtype(compute_dtype).itemsize
    itemsize_out = jnp.dtype(out_dtype).itemsize
    cost = pl.CostEstimate(
        flops=2 * M_pad * K * E_pad,
        transcendentals=0,
        bytes_accessed=(M_pad * K * itemsize_in
                        + K * E_pad * itemsize_in
                        + M_pad * E_pad * itemsize_out),
    )

    out = pl.pallas_call(
        _patch_embed_kernel,
        out_shape=jax.ShapeDtypeStruct((M_pad, E_pad), out_dtype),
        grid=grid,
        in_specs=[
            pl.BlockSpec((tm, K), lambda i: (i, 0)),        # streamed rows
            pl.BlockSpec((K, E_pad), lambda i: (0, 0)),     # resident weight
            pl.BlockSpec((1, E_pad), lambda i: (0, 0)),     # resident bias
        ],
        out_specs=pl.BlockSpec((tm, E_pad), lambda i: (i, 0)),
        compiler_params=pltpu.CompilerParams(
            dimension_semantics=("parallel",),
            vmem_limit_bytes=64 * 1024 * 1024,
        ),
        cost_estimate=cost,
    )(patches, w_mat, b_mat)

    return out[:M, :E].reshape(B, N, E)


if __name__ == "__main__":
    # Small shapes consistent with the module: img=16, patch=4, C=4, E=32.
    B, C, H, W = 2, 4, 16, 16
    patch_size = 4
    embed_dim = 32

    key = jax.random.PRNGKey(0)
    kx, kw, kb = jax.random.split(key, 3)
    x = jax.random.normal(kx, (B, C, H, W), dtype=jnp.float32)
    weight = jax.random.normal(kw, (embed_dim, C, patch_size, patch_size),
                               dtype=jnp.float32) * 0.02
    bias = jax.random.normal(kb, (embed_dim,), dtype=jnp.float32) * 0.02

    out = patch_embed_forward(x, weight, bias, patch_size)
    out = jax.block_until_ready(out)

    # Reference: strided conv via lax, then flatten(2).transpose(1, 2).
    ref = jax.lax.conv_general_dilated(
        x, weight, window_strides=(patch_size, patch_size), padding="VALID",
        dimension_numbers=("NCHW", "OIHW", "NCHW"))
    ref = ref + bias.reshape(1, embed_dim, 1, 1)
    ref = ref.reshape(B, embed_dim, -1).transpose(0, 2, 1)

    assert out.shape == (B, (H // patch_size) * (W // patch_size), embed_dim)
    assert jnp.allclose(out, ref, atol=1e-4, rtol=1e-4)
    print("KERNEL_OK")
</pallas_src>

<mosaic_0001>
module attributes {stable_mosaic.version = 11 : i64} {
  func.func @_patch_embed_kernel(%arg0: i32, %arg1: memref<32x64xf32, #tpu.memory_space<vmem>>, %arg2: memref<64x128xf32, #tpu.memory_space<vmem>>, %arg3: memref<1x128xf32, #tpu.memory_space<vmem>>, %arg4: memref<32x128xf32, #tpu.memory_space<vmem>>) attributes {dimension_semantics = [#tpu.dimension_semantics<parallel>], iteration_bounds = array<i64: 1>, scalar_prefetch = 0 : i64, scratch_operands = 0 : i64, tpu.core_type = #tpu.core_type<tc>, window_params = [{transform_indices = @transform_0, window_bounds = array<i64: 32, 64>}, {pipeline_mode = #tpu.pipeline_mode<synchronous>, transform_indices = @transform_1, window_bounds = array<i64: 64, 128>}, {pipeline_mode = #tpu.pipeline_mode<synchronous>, transform_indices = @transform_2, window_bounds = array<i64: 1, 128>}, {transform_indices = @transform_3, window_bounds = array<i64: 32, 128>}]} {
    %c0 = arith.constant 0 : index
    %c0_0 = arith.constant 0 : index
    %0 = vector.load %arg1[%c0, %c0_0] : memref<32x64xf32, #tpu.memory_space<vmem>>, vector<32x64xf32>
    %c0_1 = arith.constant 0 : index
    %c0_2 = arith.constant 0 : index
    %1 = vector.load %arg2[%c0_1, %c0_2] : memref<64x128xf32, #tpu.memory_space<vmem>>, vector<64x128xf32>
    %cst = arith.constant dense<0.000000e+00> : vector<32x128xf32>
    %2 = tpu.matmul %0, %1, %cst {dimension_numbers = #tpu.dot_dimension_numbers<[1], [0], [0], [1], [0, 0, 1, 1], [], []>} : vector<32x64xf32>, vector<64x128xf32>, vector<32x128xf32> -> vector<32x128xf32>
    %c0_3 = arith.constant 0 : index
    %c0_4 = arith.constant 0 : index
    %3 = vector.load %arg3[%c0_3, %c0_4] : memref<1x128xf32, #tpu.memory_space<vmem>>, vector<1x128xf32>
    %4 = vector.broadcast %3 : vector<1x128xf32> to vector<32x128xf32>
    %5 = arith.addf %2, %4 : vector<32x128xf32>
    %c0_5 = arith.constant 0 : index
    %c0_6 = arith.constant 0 : index
    %6 = vector.load %arg4[%c0_5, %c0_6] : memref<32x128xf32, #tpu.memory_space<vmem>>, vector<32x128xf32>
    tpu.vector_store %arg4[%c0_5, %c0_6], %5 {strides = array<i32>} : memref<32x128xf32, #tpu.memory_space<vmem>>, vector<32x128xf32>,
    return
  }
  func.func @transform_0(%arg0: i32) -> (i32, i32) {
    %c0_i32 = arith.constant 0 : i32
    %c0_i32_0 = arith.constant 0 : i32
    return %arg0, %c0_i32 : i32, i32
  }
  func.func @transform_1(%arg0: i32) -> (i32, i32) {
    %c0_i32 = arith.constant 0 : i32
    %c0_i32_0 = arith.constant 0 : i32
    %c0_i32_1 = arith.constant 0 : i32
    return %c0_i32, %c0_i32_0 : i32, i32
  }
  func.func @transform_2(%arg0: i32) -> (i32, i32) {
    %c0_i32 = arith.constant 0 : i32
    %c0_i32_0 = arith.constant 0 : i32
    %c0_i32_1 = arith.constant 0 : i32
    return %c0_i32, %c0_i32_0 : i32, i32
  }
  func.func @transform_3(%arg0: i32) -> (i32, i32) {
    %c0_i32 = arith.constant 0 : i32
    %c0_i32_0 = arith.constant 0 : i32
    return %arg0, %c0_i32 : i32, i32
  }
}

</mosaic_0001>

<bundles_post_ra>
// kernel: patch_embed_forward.1
= control target key start
LH: loop header
LB: loop body
LE: loop exit
PB: predicated region body
PF: predicated region fallthrough
CT: control target
= control target key end

     0   :  { %8 = vsyncpa [#allocation3], 0  ;;  %s450_s0 = inlined_call_operand.hbm [shape: f32[32,64], index: 0, kind: input, shape index: {}]   ;;  %s451_s1 = inlined_call_operand.hbm [shape: f32[64,128], index: 1, kind: input, shape index: {}]   ;;  %s452_s2 = inlined_call_operand.hbm [shape: f32[1,128], index: 2, kind: input, shape index: {}]   ;;  %s453_s3 = inlined_call_operand.hbm [shape: f32[32,128], index: 3, kind: output, shape index: {}]  }
   0x1   :  { %9 = vsyncpa [#allocation6], 0 }
   0x2   :  { %10 = vsyncpa [#allocation4], 0  ;;  %s356_s12 = smov [#allocation5]   ;;  %s357_s14 = smov [#allocation2]  }
   0x3   :  { %s28_s13 = sshll.u32 %s356_s12, 4  ;;  %s16_s15 = sshll.u32 %s357_s14, 4  ;;  %s29_s13 = int_to_ptr.vmem [resolvable:$true] %s28_s13  ;;  %s382_s15 = int_to_ptr.vmem [resolvable:$true] %s16_s15 }
   0x4   :  { %s262_s18 = scalar_lea.hbm %s451_s1, 1024 }
   0x5   :  { %p263_p0 = scmp.ne.s32.totalorder %s451_s1, %s262_s18  ;;  %p266_p1 = scmp.lt.u32.totalorder %s262_s18, %s451_s1 }
   0x7   :  { %p268_p2 = pnand %p266_p1, %p263_p0 }
   0x9   :  { %271 = shalt.err (!%p268_p2)
}
   0xa   :  { %s272_s23 = scalar_lea.vmem %s29_s13, 1024  ;;  %p277_p4 = scmp.lt.s32.totalorder %s29_s13, %s29_s13 }
   0xb   :  { %p273_p3 = scmp.ne.s32.totalorder %s29_s13, %s272_s23  ;;  %p278_p5 = scmp.lt.s32.totalorder %s272_s23, %s272_s23 }
   0xd   :  { %p279_p6 = por %p278_p5, %p277_p4 }
   0xf   :  { %p280_p7 = pnand %p279_p6, %p273_p3 }
  0x11   :  { %283 = shalt.err (!%p280_p7)
}
  0x12   :  { %s358_s24 = smov 128   ;;  %s359_s25 = smov 8  }
  0x13   :  { %34 = dma.hbm_to_vmem [thread:$0]  %s451_s1, 1024, %s29_s13, [#allocation6], %s358_s24, %s358_s24, %s359_s25  }
  0x14   :  { %s284_s30 = scalar_lea.hbm %s450_s0, 512 }
  0x15   :  { %p285_p8 = scmp.ne.s32.totalorder %s450_s0, %s284_s30  ;;  %p288_p9 = scmp.lt.u32.totalorder %s284_s30, %s450_s0 }
  0x17   :  { %p290_p10 = pnand %p288_p9, %p285_p8 }
  0x19   :  { %293 = shalt.err (!%p290_p10)
}
  0x1a   :  { %s294_s8 = scalar_lea.vmem %s382_s15, 512  ;;  %p299_p12 = scmp.lt.s32.totalorder %s382_s15, %s382_s15 }
  0x1b   :  { %p295_p11 = scmp.ne.s32.totalorder %s382_s15, %s294_s8  ;;  %p300_p13 = scmp.lt.s32.totalorder %s294_s8, %s294_s8 }
  0x1d   :  { %p301_p0 = por %p300_p13, %p299_p12 }
  0x1f   :  { %p302_p1 = pnand %p301_p0, %p295_p11 }
  0x21   :  { %305 = shalt.err (!%p302_p1)
}
  0x22   :  { %22 = dma.hbm_to_vmem [thread:$0]  %s450_s0, 512, %s382_s15, [#allocation3], %s358_s24, %s358_s24, %s359_s25  }
  0x23   :  { %s360_s10 = smov [#allocation7]   ;;  %s306_s14 = scalar_lea.hbm %s452_s2, 16 }
  0x24   :  { %s41_s11 = sshll.u32 %s360_s10, 4  ;;  %p307_p2 = scmp.ne.s32.totalorder %s452_s2, %s306_s14  ;;  %s42_s11 = int_to_ptr.vmem [resolvable:$true] %s41_s11 }
  0x25   :  { %p310_p3 = scmp.lt.u32.totalorder %s306_s14, %s452_s2 }
  0x27   :  { %p312_p4 = pnand %p310_p3, %p307_p2 }
  0x29   :  { %315 = shalt.err (!%p312_p4)
}
  0x2a   :  { %s316_s20 = scalar_lea.vmem %s42_s11, 16  ;;  %s320_s0 = scalar_lea.vmem %s42_s11, 32 }
  0x2b   :  { %p317_p5 = scmp.ne.s32.totalorder %s42_s11, %s316_s20  ;;  %p321_p6 = scmp.lt.s32.totalorder %s42_s11, %s42_s11 }
  0x2c   :  { %p322_p7 = scmp.lt.s32.totalorder %s320_s0, %s316_s20 }
  0x2e   :  { %p323_p8 = por %p322_p7, %p321_p6 }
  0x30   :  { %p324_p9 = pnand %p323_p8, %p317_p5 }
  0x32   :  { %327 = shalt.err (!%p324_p9)
}
  0x33   :  { %44 = dma.hbm_to_vmem [thread:$0]  %s452_s2, 16, %s42_s11, [#allocation6]  }
  0x34   :  { %350 = dma.done.wait [#allocation3], 512  }
  0x35   :  { %351 = vsyncadd [#allocation3], 4294966784 }
  0x36   :  { %352 = dma.done.wait [#allocation6], 1040  }
  0x37   :  { %353 = vsyncadd [#allocation6], 4294966256  ;;  %v58_v0 = vld [vmem:[#allocation5] sm:$0xff]  ;;  %v59_v1 = vld [vmem:[#allocation5 + $0x8] sm:$0xff]  ;;  %vm73_vm0 = vcmask 523264   ;;  %s361_s2 = smov [#allocation8]  }
  0x38   :  { %v60_v2 = vld [vmem:[#allocation5 + $0x10] sm:$0xff]  ;;  %v232_v3 = vpack.c.bf16 %v59_v1, %v58_v0  ;;  %v61_v4 = vld [vmem:[#allocation5 + $0x18] sm:$0xff]  ;;  %v62_v6 = vld [vmem:[#allocation5 + $0x20] sm:$0xff]  ;;  %s180_s22 = sshll.u32 %s361_s2, 4  ;;  %s181_s22 = int_to_ptr.vmem [resolvable:$true] %s180_s22 }
  0x39   :  { %v236_v5 = vpack.c.bf16 %v61_v4, %v60_v2  ;;  %v63_v7 = vld [vmem:[#allocation5 + $0x28] sm:$0xff]  ;;  %v54_v8 = vld [vmem:[#allocation2] sm:$0xff]  ;;  %v56_v9 = vld [vmem:[#allocation2 + $0x10] sm:$0xff]  ;;  %s328_s23 = scalar_lea.vmem %s181_s22, 512  ;;  %p333_p11 = scmp.lt.s32.totalorder %s181_s22, %s181_s22 }
  0x3a   :  { %233 = vmatprep.subr.bf16.mxu0 %v232_v3  ;;  %248 = vmatprep.subr.bf16.mxu1 %v232_v3  ;;  %v240_v10 = vpack.c.bf16 %v63_v7, %v62_v6  ;;  %v64_v11 = vld [vmem:[#allocation5 + $0x30] sm:$0xff]  ;;  %v65_v12 = vld [vmem:[#allocation5 + $0x38] sm:$0xff]  ;;  %v55_v14 = vld [vmem:[#allocation2 + $0x8] sm:$0xff]  ;;  %p329_p10 = scmp.ne.s32.totalorder %s181_s22, %s328_s23  ;;  %p334_p12 = scmp.lt.s32.totalorder %s328_s23, %s328_s23 }
  0x3b   :  { %235 = vmatpush3.bf16.msra.mxu0 %v232_v3  ;;  %252 = vmatpush3.bf16.msra.mxu1 %v232_v3  ;;  %v244_v13 = vpack.c.bf16 %v65_v12, %v64_v11  ;;  %v57_v15 = vld [vmem:[#allocation2 + $0x18] sm:$0xff]  ;;  %v193_v16 = vld [vmem:[#allocation7] ss:$0 sm:$0xff] }
  0x3c   :  { %237 = vmatprep.subr.bf16.mxu0 %v236_v5  ;;  %249 = vmatprep.subr.bf16.mxu1 %v236_v5  ;;  %p335_p13 = por %p334_p12, %p333_p11 }
  0x3d   :  { %226 = vmatprep.mubr.msk.f32.mxu0 %vm73_vm0, %v54_v8  ;;  %229 = vmatprep.mubr.msk.f32.mxu1 %vm73_vm0, %v56_v9 }
  0x3e   :  { %p336_p0 = pnand %p335_p13, %p329_p10 }
  0x3f   :  { %239 = vmatpush3.bf16.msra.mxu0 %v236_v5  ;;  %253 = vmatpush3.bf16.msra.mxu1 %v236_v5 }
  0x40   :  { %241 = vmatprep.subr.bf16.mxu0 %v240_v10  ;;  %250 = vmatprep.subr.bf16.mxu1 %v240_v10 }
  0x43   :  { %243 = vmatpush3.bf16.msra.mxu0 %v240_v10  ;;  %254 = vmatpush3.bf16.msra.mxu1 %v240_v10 }
  0x44   :  { %245 = vmatprep.subr.bf16.mxu0 %v244_v13  ;;  %251 = vmatprep.subr.bf16.mxu1 %v244_v13 }
  0x47   :  { %247 = vmatpush3.bf16.msra.mxu0 %v244_v13  ;;  %255 = vmatpush3.bf16.msra.mxu1 %v244_v13 }
  0x4a   :  { %227 = vmatmul.mubr.msk.f32.vlgmr.msra.gmra.mrb[0].mxu0 %vm73_vm0, %v55_v14  ;;  %230 = vmatmul.mubr.msk.f32.vlgmr.msra.gmra.mrb[0].mxu1 %vm73_vm0, %v57_v15 }
 0x11d   :  { %v228_v17 = vpop.f32.mrb[0].mxu0  ;;  %v231_v18 = vpop.f32.mrb[0].mxu1 }
 0x11e   :  { %v158_v19 = vadd.f32 %v228_v17, %v193_v16  ;;  %v168_v20 = vadd.f32 %v231_v18, %v193_v16  ;;  %v152_v21 = vpop.f32.mrb[1].mxu0  ;;  %v162_v22 = vpop.f32.mrb[1].mxu1 }
 0x11f   :  { %v153_v23 = vadd.f32 %v193_v16, %v152_v21  ;;  %v163_v24 = vadd.f32 %v193_v16, %v162_v22 }
 0x120   :  { %172 = vst [vmem:[#allocation8 + $0x8] sm:$0xff] %v158_v19  ;;  %174 = vst [vmem:[#allocation8 + $0x18] sm:$0xff] %v168_v20 }
 0x121   :  { %171 = vst [vmem:[#allocation8] sm:$0xff] %v153_v23  ;;  %173 = vst [vmem:[#allocation8 + $0x10] sm:$0xff] %v163_v24 }
 0x122   :  { %339 = shalt.err (!%p336_p0)
}
 0x123   :  { %s340_s28 = scalar_lea.hbm %s453_s3, 512 }
 0x124   :  { %p341_p1 = scmp.ne.s32.totalorder %s453_s3, %s340_s28  ;;  %p344_p2 = scmp.lt.u32.totalorder %s340_s28, %s453_s3 }
 0x126   :  { %p346_p3 = pnand %p344_p2, %p341_p1 }
 0x128   :  { %349 = shalt.err (!%p346_p3)
}
 0x129   :  { %186 = dma.vmem_to_hbm [thread:$0]  %s181_s22, 512, %s453_s3, [#allocation4], %s358_s24, %s358_s24, %s359_s25  }
 0x12a   :  { %354 = dma.done.wait [#allocation4], 512  }
 0x12b   :  { %355 = vsyncadd [#allocation4], 4294966784 }
 0x12c   :  { %190 = vsyncpa [#allocation3], 1 }
 0x12d   :  { %191 = vsyncpa [#allocation6], 1 }
 0x12e   :  { %192 = vsyncpa [#allocation4], 1 }

</bundles_post_ra>
